<compile_context>
chip_gen: v6e
topology: v6e:2x2x1
jax: 0.10.0
libtpu: 0.0.40
codegen_flags: <defaults>
</compile_context>

<pallas_src>
import functools
import math

import jax
import jax.numpy as jnp
from jax.experimental import pallas as pl
from jax.experimental.pallas import tpu as pltpu


def _round_up(x: int, m: int) -> int:
    return ((x + m - 1) // m) * m


def _packing_group(num_features: int) -> int:
    """How many atoms share one 128-lane output row."""
    if num_features < 128 and 128 % num_features == 0:
        return 128 // num_features
    return 1  # already lane-dense (or awkward F); one atom per output row


def pack_embedding_weight(weight: jax.Array):
    """Parameter prep -- do ONCE at init, not per forward call.

    weight: [T, F] raw e3nn Linear weight.
    Returns (packed_weight [G*T, G*F], G) with
      packed_weight[g*T + t, h*F + j] = weight[t, j] if g == h else 0.
    """
    t, f = weight.shape
    g = _packing_group(f)
    if g == 1:
        return weight, 1
    eye = jnp.eye(g, dtype=weight.dtype)
    packed = jnp.einsum("gh,tf->gthf", eye, weight).reshape(g * t, g * f)
    return packed, g


def embedding_kernel(z_ref, w_ref, o_ref, *, scale: float, num_types: int, group: int):
    """z_ref: (tile_rows, G) int32 atom types (G atoms per packed row)
       w_ref: (G*T, G*F) f32 block-diagonal weight (VMEM-resident, fetched once)
       o_ref: (tile_rows, G*F) f32 packed output (128 lanes when G*F == 128)
    """
    tile_rows = z_ref.shape[0]
    gt = w_ref.shape[0]  # G*T
    # Scaled packed one-hot on the VPU: column c (belonging to group g = c//T)
    # is hot for a row iff z[row, g] == c - g*T.  The e3nn path normalization
    # 1/sqrt(T) is folded into the select so there is no post-matmul multiply.
    # `group` is tiny (<= 4 here): a static loop of compare+select is
    # negligible VPU work; the binding unit of this kernel is the HBM store.
    col = jax.lax.broadcasted_iota(jnp.int32, (tile_rows, gt), 1)
    one_hot = jnp.zeros((tile_rows, gt), jnp.float32)
    for g in range(group):
        target = z_ref[:, g:g + 1] + g * num_types            # (tile_rows, 1)
        one_hot = jnp.where(col == target, scale, one_hot)
    # MXU matmul: [tile_rows, G*T] @ [G*T, G*F] -> [tile_rows, G*F].
    o_ref[...] = jnp.dot(one_hot, w_ref[...], preferred_element_type=jnp.float32)


def embedding_layer(atomic_numbers: jax.Array,
                    packed_weight: jax.Array,
                    *,
                    num_types: int,
                    num_features: int,
                    group: int,
                    tile_rows: int = 1024) -> jax.Array:
    """Pallas equivalent of Embedding_layer.forward.

    atomic_numbers: int array [N], values in [0, num_types)
    packed_weight:  output of pack_embedding_weight (built once at init)
    returns:        f32 array [N, num_features]
    """
    n = atomic_numbers.shape[0]
    scale = 1.0 / math.sqrt(num_types)
    gt, gf = packed_weight.shape
    assert gt == group * num_types and gf == group * num_features

    # Pad atoms to a multiple of the packing group (<= group-1 extra rows; zero
    # cost when N is already a multiple, as in typical batches).
    n_pack = _round_up(n, group)
    z = atomic_numbers.astype(jnp.int32)
    if n_pack != n:
        z = jnp.pad(z, (0, n_pack - n))
    n_rows = n_pack // group
    z2d = z.reshape(n_rows, group)

    # Tile the packed-row axis.  Big tiles amortize the ~0.35 us/step grid
    # overhead; clamp so the grid has >= 2 steps when possible so both v7x
    # TensorCores get work (no effect on v5e/v6e).
    tile_rows = max(8, tile_rows)
    tile_rows = min(tile_rows, _round_up(pl.cdiv(n_rows, 2), 8))
    grid = (pl.cdiv(n_rows, tile_rows),)   # ragged last block handled by Pallas

    out_packed = pl.pallas_call(
        functools.partial(embedding_kernel, scale=scale,
                          num_types=num_types, group=group),
        out_shape=jax.ShapeDtypeStruct((n_rows, gf), jnp.float32),
        grid=grid,
        in_specs=[
            # Packed atom types: one small block per grid step.
            pl.BlockSpec((tile_rows, group), lambda i: (i, 0)),
            # Weight: constant index_map -> fetched once, VMEM-resident.
            pl.BlockSpec((gt, gf), lambda i: (0, 0)),
        ],
        out_specs=pl.BlockSpec((tile_rows, gf), lambda i: (i, 0)),
        compiler_params=pltpu.CompilerParams(
            dimension_semantics=("parallel",),
        ),
        cost_estimate=pl.CostEstimate(
            flops=2 * n_rows * gt * gf,
            transcendentals=0,
            # True (unpadded) traffic: z read + weight read + output write.
            bytes_accessed=n_pack * 4 + gt * gf * 4 + n_pack * num_features * 4,
        ),
    )(z2d, packed_weight)

    # (n_rows, G*F) -> (n_pack, F) is a bit-identical row-major view: free.
    out = out_packed.reshape(n_pack, num_features)
    if n_pack != n:
        out = out[:n]
    return out


def embedding_layer_ref(atomic_numbers: jax.Array, weight: jax.Array) -> jax.Array:
    """Pure-JAX reference for correctness checking."""
    t = weight.shape[0]
    one_hot = jax.nn.one_hot(atomic_numbers, t, dtype=jnp.float32)
    return (one_hot @ weight) / math.sqrt(t)


if __name__ == "__main__":
    num_types = 16      # number of atomic species
    num_features = 32   # embedding width
    num_atoms = 8       # batch of atoms

    key = jax.random.PRNGKey(0)
    k_w, k_z = jax.random.split(key)

    # Deterministic synthetic parameters (e3nn Linear weights ~ N(0, 1)).
    weight = jax.random.normal(k_w, (num_types, num_features), dtype=jnp.float32)
    atomic_numbers = jax.random.randint(k_z, (num_atoms,), 0, num_types, dtype=jnp.int32)

    # Pack the weight once (parameter-init time), then run the forward.
    packed_weight, group = pack_embedding_weight(weight)
    packed_weight = jax.block_until_ready(packed_weight)

    out = embedding_layer(atomic_numbers, packed_weight,
                          num_types=num_types, num_features=num_features,
                          group=group)
    out = jax.block_until_ready(out)

    ref = embedding_layer_ref(atomic_numbers, weight)
    assert out.shape == (num_atoms, num_features)
    assert out.dtype == jnp.float32
    assert jnp.allclose(out, ref, atol=1e-5, rtol=1e-5)

    # TODO(synk): torch's F.one_hot raises on out-of-range/negative indices; here
    # such rows silently become all-zero -- validate indices outside if needed.

    print("KERNEL_OK")
</pallas_src>

<mosaic_0001>
module attributes {stable_mosaic.version = 11 : i64} {
  func.func @embedding_kernel(%arg0: i32, %arg1: memref<8x4xi32, #tpu.memory_space<vmem>>, %arg2: memref<64x128xf32, #tpu.memory_space<vmem>>, %arg3: memref<8x128xf32, #tpu.memory_space<vmem>>) attributes {dimension_semantics = [#tpu.dimension_semantics<parallel>], iteration_bounds = array<i64: 1>, scalar_prefetch = 0 : i64, scratch_operands = 0 : i64, tpu.core_type = #tpu.core_type<tc>, window_params = [{transform_indices = @transform_0, window_bounds = array<i64: 8, 4>}, {pipeline_mode = #tpu.pipeline_mode<synchronous>, transform_indices = @transform_1, window_bounds = array<i64: 64, 128>}, {transform_indices = @transform_2, window_bounds = array<i64: 8, 128>}]} {
    %0 = tpu.iota {dimensions = array<i32: 1>} : vector<8x64xi32>
    %cst = arith.constant 0.000000e+00 : f32
    %1 = vector.broadcast %cst : f32 to vector<8x64xf32>
    %c0 = arith.constant 0 : index
    %c0_0 = arith.constant 0 : index
    %2 = vector.load %arg1[%c0, %c0_0] : memref<8x4xi32, #tpu.memory_space<vmem>>, vector<8x1xi32>
    %c0_i32 = arith.constant 0 : i32
    %3 = vector.broadcast %c0_i32 : i32 to vector<8x1xi32>
    %4 = arith.addi %2, %3 : vector<8x1xi32>
    %5 = vector.broadcast %4 : vector<8x1xi32> to vector<8x64xi32>
    %6 = arith.cmpi eq, %0, %5 : vector<8x64xi32>
    %cst_1 = arith.constant 2.500000e-01 : f32
    %7 = vector.broadcast %cst_1 : f32 to vector<8x64xf32>
    %8 = arith.select %6, %7, %1 : vector<8x64xi1>, vector<8x64xf32>
    %c0_2 = arith.constant 0 : index
    %c1 = arith.constant 1 : index
    %9 = vector.load %arg1[%c0_2, %c1] : memref<8x4xi32, #tpu.memory_space<vmem>>, vector<8x1xi32>
    %c16_i32 = arith.constant 16 : i32
    %10 = vector.broadcast %c16_i32 : i32 to vector<8x1xi32>
    %11 = arith.addi %9, %10 : vector<8x1xi32>
    %12 = vector.broadcast %11 : vector<8x1xi32> to vector<8x64xi32>
    %13 = arith.cmpi eq, %0, %12 : vector<8x64xi32>
    %cst_3 = arith.constant 2.500000e-01 : f32
    %14 = vector.broadcast %cst_3 : f32 to vector<8x64xf32>
    %15 = arith.select %13, %14, %8 : vector<8x64xi1>, vector<8x64xf32>
    %c0_4 = arith.constant 0 : index
    %c2 = arith.constant 2 : index
    %16 = vector.load %arg1[%c0_4, %c2] : memref<8x4xi32, #tpu.memory_space<vmem>>, vector<8x1xi32>
    %c32_i32 = arith.constant 32 : i32
    %17 = vector.broadcast %c32_i32 : i32 to vector<8x1xi32>
    %18 = arith.addi %16, %17 : vector<8x1xi32>
    %19 = vector.broadcast %18 : vector<8x1xi32> to vector<8x64xi32>
    %20 = arith.cmpi eq, %0, %19 : vector<8x64xi32>
    %cst_5 = arith.constant 2.500000e-01 : f32
    %21 = vector.broadcast %cst_5 : f32 to vector<8x64xf32>
    %22 = arith.select %20, %21, %15 : vector<8x64xi1>, vector<8x64xf32>
    %c0_6 = arith.constant 0 : index
    %c3 = arith.constant 3 : index
    %23 = vector.load %arg1[%c0_6, %c3] : memref<8x4xi32, #tpu.memory_space<vmem>>, vector<8x1xi32>
    %c48_i32 = arith.constant 48 : i32
    %24 = vector.broadcast %c48_i32 : i32 to vector<8x1xi32>
    %25 = arith.addi %23, %24 : vector<8x1xi32>
    %26 = vector.broadcast %25 : vector<8x1xi32> to vector<8x64xi32>
    %27 = arith.cmpi eq, %0, %26 : vector<8x64xi32>
    %cst_7 = arith.constant 2.500000e-01 : f32
    %28 = vector.broadcast %cst_7 : f32 to vector<8x64xf32>
    %29 = arith.select %27, %28, %22 : vector<8x64xi1>, vector<8x64xf32>
    %c0_8 = arith.constant 0 : index
    %c0_9 = arith.constant 0 : index
    %30 = vector.load %arg2[%c0_8, %c0_9] : memref<64x128xf32, #tpu.memory_space<vmem>>, vector<64x128xf32>
    %cst_10 = arith.constant dense<0.000000e+00> : vector<8x128xf32>
    %31 = tpu.matmul %29, %30, %cst_10 {dimension_numbers = #tpu.dot_dimension_numbers<[1], [0], [0], [1], [0, 0, 1, 1], [], []>} : vector<8x64xf32>, vector<64x128xf32>, vector<8x128xf32> -> vector<8x128xf32>
    %c0_11 = arith.constant 0 : index
    %c0_12 = arith.constant 0 : index
    %32 = vector.load %arg3[%c0_11, %c0_12] : memref<8x128xf32, #tpu.memory_space<vmem>>, vector<8x128xf32>
    tpu.vector_store %arg3[%c0_11, %c0_12], %31 {strides = array<i32>} : memref<8x128xf32, #tpu.memory_space<vmem>>, vector<8x128xf32>,
    return
  }
  func.func @transform_0(%arg0: i32) -> (i32, i32) {
    %c0_i32 = arith.constant 0 : i32
    %c0_i32_0 = arith.constant 0 : i32
    return %arg0, %c0_i32 : i32, i32
  }
  func.func @transform_1(%arg0: i32) -> (i32, i32) {
    %c0_i32 = arith.constant 0 : i32
    %c0_i32_0 = arith.constant 0 : i32
    %c0_i32_1 = arith.constant 0 : i32
    return %c0_i32, %c0_i32_0 : i32, i32
  }
  func.func @transform_2(%arg0: i32) -> (i32, i32) {
    %c0_i32 = arith.constant 0 : i32
    %c0_i32_0 = arith.constant 0 : i32
    return %arg0, %c0_i32 : i32, i32
  }
}

</mosaic_0001>

<bundles_post_ra>
// kernel: tpu_custom_call.1
= control target key start
LH: loop header
LB: loop body
LE: loop exit
PB: predicated region body
PF: predicated region fallthrough
CT: control target
= control target key end

     0   :  { %7 = vsyncpa [#allocation3], 0  ;;  %s323_s0 = inlined_call_operand.hbm [shape: s32[2,4], index: 0, kind: input, shape index: {}]   ;;  %s324_s1 = inlined_call_operand.hbm [shape: f32[64,128], index: 1, kind: input, shape index: {}]   ;;  %s325_s2 = inlined_call_operand.hbm [shape: f32[2,128], index: 2, kind: output, shape index: {}]  }
   0x1   :  { %8 = vsyncpa [#allocation6], 0 }
   0x2   :  { %9 = vsyncpa [#allocation4], 0 }
   0x3   :  { %14 = vsyncadd [#allocation3], 96  ;;  %s280_s9 = smov [#allocation2]  }
   0x4   :  { %s15_s10 = sshll.u32 %s280_s9, 4  ;;  %s16_s10 = int_to_ptr.vmem [resolvable:$true] %s15_s10 }
   0x5   :  { %s222_s11 = scalar_lea.vmem %s16_s10, 32  ;;  %s226_s12 = scalar_lea.vmem %s16_s10, 128 }
   0x6   :  { %p223_p0 = scmp.ne.s32.totalorder %s16_s10, %s222_s11  ;;  %p227_p1 = scmp.lt.s32.totalorder %s16_s10, %s16_s10 }
   0x7   :  { %p228_p2 = scmp.lt.s32.totalorder %s226_s12, %s222_s11 }
   0x9   :  { %p229_p3 = por %p228_p2, %p227_p1 }
   0xb   :  { %p230_p4 = pnand %p229_p3, %p223_p0 }
   0xd   :  { %233 = shalt.err (!%p230_p4)
}
   0xe   :  { %s281_s13 = smov 32   ;;  %s282_s14 = smov 2  }
   0xf   :  { %21 = dma.hbm_to_vmem [thread:$0]  %s323_s0, 32, %s16_s10, [#allocation3], %s281_s13, %s281_s13, %s282_s14  }
  0x10   :  { %s283_s17 = smov [#allocation5]  }
  0x11   :  { %s27_s18 = sshll.u32 %s283_s17, 4  ;;  %s28_s18 = int_to_ptr.vmem [resolvable:$true] %s27_s18 }
  0x12   :  { %s242_s19 = scalar_lea.vmem %s28_s18, 1024  ;;  %p247_p6 = scmp.lt.s32.totalorder %s28_s18, %s28_s18 }
  0x13   :  { %p243_p5 = scmp.ne.s32.totalorder %s28_s18, %s242_s19  ;;  %p248_p7 = scmp.lt.s32.totalorder %s242_s19, %s242_s19 }
  0x15   :  { %p249_p8 = por %p248_p7, %p247_p6 }
  0x17   :  { %p250_p9 = pnand %p249_p8, %p243_p5 }
  0x19   :  { %253 = shalt.err (!%p250_p9)
}
  0x1a   :  { %s284_s20 = smov 128   ;;  %s285_s21 = smov 8  }
  0x1b   :  { %33 = dma.hbm_to_vmem [thread:$0]  %s324_s1, 1024, %s28_s18, [#allocation6], %s284_s20, %s284_s20, %s285_s21  }
  0x1c   :  { %274 = dma.done.wait [#allocation3], 128  }
  0x1d   :  { %275 = vsyncadd [#allocation3], 4294967168 }
  0x1e   :  { %276 = dma.done.wait [#allocation6], 1024  }
  0x1f   :  { %277 = vsyncadd [#allocation6], 4294966272  ;;  %v286_v0 = vmov 0   ;;  %v287_v1 = vmov 2   ;;  %v288_v2 = vmov 0.0   ;;  %v42_v3 = vld [vmem:[#allocation2] sm:$0xff]  ;;  %v40_v17 = vlaneseq }
  0x20   :  { %209 = vset.pattern.permute.xlu0 %v286_v0  ;;  %211 = vset.pattern.permute.xlu1 %v287_v1  ;;  %v73_v4 = vld [vmem:[#allocation5 + $0x38] sm:$0xff]  ;;  %v72_v5 = vld [vmem:[#allocation5 + $0x30] sm:$0xff]  ;;  %v54_v6 = vadd.s32 32, %v42_v3  ;;  %v48_v7 = vadd.s32 16, %v42_v3  ;;  %v71_v8 = vld [vmem:[#allocation5 + $0x28] sm:$0xff]  ;;  %v60_v9 = vadd.s32 48, %v42_v3 }
  0x21   :  { %177 = vmatprep.subr.mxu0 %v288_v2  ;;  %44 = vperm.xlu0 %209, %v42_v3   ;;  %v70_v10 = vld [vmem:[#allocation5 + $0x20] sm:$0xff]  ;;  %v289_v11 = vmov 1   ;;  %v69_v12 = vld [vmem:[#allocation5 + $0x18] sm:$0xff]  ;;  %v290_v13 = vmov 3   ;;  %v68_v14 = vld [vmem:[#allocation5 + $0x10] sm:$0xff]  ;;  %vm291_vm0 = vmmov 0  }
  0x22   :  { %178 = vmatpush3.msra.mxu0 %v73_v4  ;;  %56 = vperm.xlu1 %211, %v54_v6   ;;  %v67_v15 = vld [vmem:[#allocation5 + $0x8] sm:$0xff]  ;;  %v66_v16 = vld [vmem:[#allocation5] sm:$0xff]  ;;  %v41_v18 = vand.u32 127, %v40_v17  ;;  %vm74_vm4 = vcmask 523264  }
  0x23   :  { %179 = vmatprep.subr.mxu0 %v288_v2  ;;  %193 = vmatprep.mubr.msk.f32.mxu0 %vm291_vm0, %v288_v2 }
  0x24   :  { %180 = vmatpush3.msra.mxu0 %v72_v5 }
  0x25   :  { %181 = vmatprep.subr.mxu0 %v288_v2  ;;  %210 = vset.pattern.permute.xlu0 %v289_v11 }
  0x26   :  { %182 = vmatpush3.msra.mxu0 %v71_v8  ;;  %50 = vperm.xlu0 %210, %v48_v7  }
  0x27   :  { %183 = vmatprep.subr.mxu0 %v288_v2  ;;  %212 = vset.pattern.permute.xlu1 %v290_v13 }
  0x28   :  { %184 = vmatpush3.msra.mxu0 %v70_v10  ;;  %62 = vperm.xlu1 %212, %v60_v9  }
  0x29   :  { %185 = vmatprep.subr.mxu0 %v288_v2 }
  0x2a   :  { %186 = vmatpush3.msra.mxu0 %v69_v12  ;;  %213 = vset.pattern.permute.xlu0 %v290_v13 }
  0x2b   :  { %187 = vmatprep.subr.mxu0 %v288_v2 }
  0x2c   :  { %188 = vmatpush3.msra.mxu0 %v68_v14 }
  0x2d   :  { %189 = vmatprep.subr.mxu0 %v288_v2 }
  0x2e   :  { %190 = vmatpush3.msra.mxu0 %v67_v15 }
  0x2f   :  { %191 = vmatprep.subr.mxu0 %v288_v2 }
  0x30   :  { %192 = vmatpush3.msra.mxu0 %v66_v16 }
  0x9c   :  { %v45_v19 = vpop.permute.xlu0 %44 }
  0x9d   :  { %v57_v20 = vpop.permute.xlu1 %56  ;;  %vm46_vm1 = vcmp.eq.s32.totalorder %v41_v18, %v45_v19 }
  0x9e   :  { %v47_v22 = vsel %vm46_vm1, 0.25, %v288_v2  ;;  %vm58_vm3 = vcmp.eq.s32.totalorder %v41_v18, %v57_v20 }
  0xa1   :  { %v51_v21 = vpop.permute.xlu0 %50 }
  0xa2   :  { %vm52_vm2 = vcmp.eq.s32.totalorder %v41_v18, %v51_v21 }
  0xa3   :  { %v53_v23 = vsel %vm52_vm2, 0.25, %v47_v22  ;;  %v63_v24 = vpop.permute.xlu1 %62 }
  0xa4   :  { %v59_v25 = vsel %vm58_vm3, 0.25, %v53_v23  ;;  %vm64_vm5 = vcmp.eq.s32.totalorder %v41_v18, %v63_v24 }
  0xa5   :  { %v65_v26 = vsel %vm64_vm5, 0.25, %v59_v25 }
  0xa6   :  { %194 = vmatmul.mubr.msk.f32.vlgmr.msra.gmra.mxu0 %vm74_vm4, %v65_v26 }
 0x166   :  { %v144_v27 = vpop.f32.mrf.mxu0 }
 0x167   :  { %148 = vst [vmem:[#allocation7] sm:$0xff] %v144_v27 }
 0x168   :  { %v195_v28 = vpop.f32.mrf.mxu0 }
 0x169   :  { %153 = vsyncadd [#allocation4], 96  ;;  %s292_s0 = smov [#allocation7]  }
 0x16a   :  { %s154_s1 = sshll.u32 %s292_s0, 4  ;;  %s155_s1 = int_to_ptr.vmem [resolvable:$true] %s154_s1 }
 0x16b   :  { %s254_s24 = scalar_lea.vmem %s155_s1, 32  ;;  %s258_s25 = scalar_lea.vmem %s155_s1, 128 }
 0x16c   :  { %p255_p10 = scmp.ne.s32.totalorder %s155_s1, %s254_s24  ;;  %p259_p11 = scmp.lt.s32.totalorder %s155_s1, %s155_s1 }
 0x16d   :  { %p260_p12 = scmp.lt.s32.totalorder %s258_s25, %s254_s24 }
 0x16f   :  { %p261_p13 = por %p260_p12, %p259_p11 }
 0x171   :  { %p262_p0 = pnand %p261_p13, %p255_p10 }
 0x173   :  { %265 = shalt.err (!%p262_p0)
}
 0x174   :  { %160 = dma.vmem_to_hbm [thread:$0]  %s155_s1, 32, %s325_s2, [#allocation4], %s281_s13, %s281_s13, %s282_s14  }
 0x175   :  { %278 = dma.done.wait [#allocation4], 128  }
 0x176   :  { %279 = vsyncadd [#allocation4], 4294967168 }
 0x177   :  { %164 = vsyncpa [#allocation3], 1 }
 0x178   :  { %165 = vsyncpa [#allocation6], 1 }
 0x179   :  { %166 = vsyncpa [#allocation4], 1 }

</bundles_post_ra>
